<compile_context>
chip_gen: v5e
topology: v5e:2x2
jax: 0.10.0
libtpu: 0.0.40
codegen_flags: <defaults>
</compile_context>

<pallas_src>
import functools

import jax
import jax.numpy as jnp
from jax.experimental import pallas as pl
from jax.experimental.pallas import tpu as pltpu


LANE = 128      # lane width: feature dims padded to a multiple of this
SUBLANE = 8     # sublane width: batch tile must be a multiple of this


def _round_up(x, m):
    return ((x + m - 1) // m) * m


# ----------------------------------------------------------------------------
# Fused kernel: the whole MLP for one batch tile.
#   refs[0]           : x tile   (tile_b, in_pad_0)        bf16, lane-dense
#   refs[1 + 2l]      : W_l      (in_pad_l, out_pad_l)     bf16, VMEM-resident
#   refs[2 + 2l]      : b_l      (1, out_pad_l)            f32,  VMEM-resident
#   refs[-1]          : out tile (tile_b, out_pad_{L-1})   f32
# ----------------------------------------------------------------------------
def _mlp_kernel(*refs, n_layers, activation, compute_dtype):
    x_ref = refs[0]
    o_ref = refs[-1]
    wb = refs[1:-1]

    y = x_ref[...]                                   # bf16 activations
    # Static unroll: per-layer padded shapes are ragged and L is small, so the
    # unroll is optimal here (activations live in vregs/VMEM, never HBM).
    for l in range(n_layers):
        w_ref = wb[2 * l]
        b_ref = wb[2 * l + 1]
        acc = jnp.dot(y, w_ref[...], preferred_element_type=jnp.float32)
        acc = acc + b_ref[...]                       # (1, out_pad) broadcast
        if l < n_layers - 1:                         # hidden layers: activation
            if activation == "tanh":
                acc = jnp.tanh(acc)
            else:                                    # relu
                acc = jnp.maximum(acc, 0.0)
            y = acc.astype(compute_dtype)            # back to bf16 for next MXU
        else:
            y = acc                                  # keep f32 for the output
    o_ref[...] = y.astype(o_ref.dtype)


# ----------------------------------------------------------------------------
# One-time packing (hoisted out of the hot path) + jitted per-model forward.
# params: list of (W(in,out), b(out,)) — weights pre-transposed vs torch.
# ----------------------------------------------------------------------------
def make_mlp_forward(params, act_func="tanh", compute_dtype=jnp.bfloat16,
                     tile_b_cap=512):
    if act_func not in ("tanh", "relu"):
        raise ValueError(f"act_func must be 'tanh' or 'relu', got {act_func!r}")

    n_layers = len(params)
    n_in = int(params[0][0].shape[0])
    n_out = int(params[-1][0].shape[1])

    # Per-layer lane-dense padding (no global square d_pad): layer l's in dim
    # is padded to the previous layer's padded out dim, out dim to mult-of-128.
    in_pads, out_pads = [], []
    ws_pad, bs_pad = [], []
    prev_pad = _round_up(n_in, LANE)
    for (w, b) in params:
        d_in, d_out = int(w.shape[0]), int(w.shape[1])
        out_pad = _round_up(d_out, LANE)
        w_p = jnp.zeros((prev_pad, out_pad), compute_dtype)
        w_p = w_p.at[:d_in, :d_out].set(jnp.asarray(w, compute_dtype))
        b_p = jnp.zeros((1, out_pad), jnp.float32)
        b_p = b_p.at[0, :d_out].set(jnp.asarray(b, jnp.float32))
        ws_pad.append(w_p)
        bs_pad.append(b_p)
        in_pads.append(prev_pad)
        out_pads.append(out_pad)
        prev_pad = out_pad

    d_in_pad = in_pads[0]
    d_out_pad = out_pads[-1]
    itemsize = jnp.dtype(compute_dtype).itemsize

    kernel = functools.partial(
        _mlp_kernel, n_layers=n_layers, activation=act_func,
        compute_dtype=compute_dtype)

    # Interleaved resident weight/bias specs (constant block index -> fetched
    # once and kept in VMEM across all batch tiles).
    wb_arrays, wb_specs = [], []
    for l in range(n_layers):
        wb_arrays += [ws_pad[l], bs_pad[l]]
        wb_specs += [
            pl.BlockSpec((in_pads[l], out_pads[l]), lambda i: (0, 0)),
            pl.BlockSpec((1, out_pads[l]), lambda i: (0, 0)),
        ]
    w_bytes = sum(int(w.size) * w.dtype.itemsize for w in ws_pad)
    b_bytes = sum(int(b.size) * b.dtype.itemsize for b in bs_pad)

    @jax.jit
    def forward(x):
        x = jnp.asarray(x, jnp.float32)
        B = x.shape[0]

        # Balanced batch tiling: minimize last-tile padding, cap at tile_b_cap
        # rows, and force >= 2 tiles when B > 8 so the "parallel" axis can
        # shard across v7x's two TensorCores.
        n_tiles = max(-(-B // tile_b_cap), 2 if B > SUBLANE else 1)
        tile_b = _round_up(-(-B // n_tiles), SUBLANE)
        b_pad = tile_b * n_tiles

        x_pad = jnp.zeros((b_pad, d_in_pad), compute_dtype)
        x_pad = x_pad.at[:B, :n_in].set(x.astype(compute_dtype))

        # Advisory cost estimate (padded sizes = what actually executes).
        flops = 2 * b_pad * sum(in_pads[l] * out_pads[l] for l in range(n_layers))
        transcendentals = (b_pad * sum(out_pads[:-1])) if act_func == "tanh" else 0
        x_bytes = b_pad * d_in_pad * itemsize
        o_bytes = b_pad * d_out_pad * 4
        bytes_accessed = w_bytes + b_bytes + x_bytes + o_bytes

        # Explicit VMEM budget: resident W/b (worst case 2 buffers each) +
        # double-buffered x / out tiles + headroom; clamp to sane bounds.
        x_tile_bytes = tile_b * d_in_pad * itemsize
        o_tile_bytes = tile_b * d_out_pad * 4
        vmem_limit = (2 * (w_bytes + b_bytes)
                      + 2 * (x_tile_bytes + o_tile_bytes) + (4 << 20))
        vmem_limit = int(min(max(vmem_limit, 32 << 20), 100 << 20))

        y_pad = pl.pallas_call(
            kernel,
            out_shape=jax.ShapeDtypeStruct((b_pad, d_out_pad), jnp.float32),
            grid_spec=pltpu.PrefetchScalarGridSpec(
                num_scalar_prefetch=0,
                grid=(n_tiles,),
                in_specs=[pl.BlockSpec((tile_b, d_in_pad), lambda i: (i, 0))]
                         + wb_specs,
                out_specs=pl.BlockSpec((tile_b, d_out_pad), lambda i: (i, 0)),
            ),
            compiler_params=pltpu.CompilerParams(
                dimension_semantics=("parallel",),   # shard batch on v7x 2-TC
                vmem_limit_bytes=vmem_limit,
            ),
            cost_estimate=pl.CostEstimate(
                flops=int(flops),
                transcendentals=int(transcendentals),
                bytes_accessed=int(bytes_accessed),
            ),
        )(x_pad, *wb_arrays)

        return y_pad[:B, :n_out]

    return forward


# ----------------------------------------------------------------------------
# Parameter init mimicking torch.nn.Linear's uniform(-1/sqrt(fan_in)) init.
# Weights stored pre-transposed as (in_features, out_features).
# ----------------------------------------------------------------------------
def init_params(key, n_inputs, n_hiddens_per_layer, n_outputs):
    if n_hiddens_per_layer in (0, [], [0]):
        n_hiddens_per_layer = []
    params = []
    fan_in = n_inputs
    sizes = list(n_hiddens_per_layer) + [n_outputs]
    for nh in sizes:
        key, kw, kb = jax.random.split(key, 3)
        bound = 1.0 / jnp.sqrt(fan_in)
        w = jax.random.uniform(kw, (fan_in, nh), jnp.float32, -bound, bound)
        b = jax.random.uniform(kb, (nh,), jnp.float32, -bound, bound)
        params.append((w, b))
        fan_in = nh
    return params


# Pure-JAX f32 reference for correctness (matches NeuralNetwork.forward).
def forward_ref(params, x, act_func="tanh"):
    y = x
    n_layers = len(params)
    for li, (w, b) in enumerate(params):
        y = y @ w + b
        if li != n_layers - 1:
            y = jnp.tanh(y) if act_func == "tanh" else jnp.maximum(y, 0.0)
    return y


# TODO(synk): train()/use() (Adam/SGD optimizer loop, X/T standardization
# state, error_trace) are host-side training utilities with no Pallas
# forward-pass equivalent; only the forward() inference path is a kernel.

if __name__ == "__main__":
    key = jax.random.PRNGKey(0)
    kx, kp, kx2 = jax.random.split(key, 3)

    batch = 8
    n_inputs = 16
    n_hiddens_per_layer = [32, 32]
    n_outputs = 4

    x = jax.random.normal(kx, (batch, n_inputs), jnp.float32)
    params = init_params(kp, n_inputs, n_hiddens_per_layer, n_outputs)

    # bf16 MXU operands -> relaxed tolerance vs the f32 reference.
    TOL = dict(atol=5e-2, rtol=5e-2)

    # tanh path
    fwd_tanh = make_mlp_forward(params, act_func="tanh")
    y = jax.block_until_ready(fwd_tanh(x))
    y_ref = forward_ref(params, x, act_func="tanh")
    assert y.shape == (batch, n_outputs)
    assert jnp.allclose(y, y_ref, **TOL), "tanh mismatch vs reference"

    # relu path
    fwd_relu = make_mlp_forward(params, act_func="relu")
    y2 = jax.block_until_ready(fwd_relu(x))
    y2_ref = forward_ref(params, x, act_func="relu")
    assert jnp.allclose(y2, y2_ref, **TOL), "relu mismatch vs reference"

    # larger / ragged batch: exercises >=2 grid tiles and batch-pad slicing
    xb = jax.random.normal(kx2, (40, n_inputs), jnp.float32)
    yb = jax.block_until_ready(fwd_tanh(xb))
    yb_ref = forward_ref(params, xb, act_func="tanh")
    assert yb.shape == (40, n_outputs)
    assert jnp.allclose(yb, yb_ref, **TOL), "multi-tile batch mismatch"

    # no-hidden-layer edge case (matches n_hiddens_per_layer == [] behavior)
    params0 = init_params(kp, n_inputs, [], n_outputs)
    fwd0 = make_mlp_forward(params0, act_func="tanh")
    y0 = jax.block_until_ready(fwd0(x))
    assert jnp.allclose(y0, forward_ref(params0, x), **TOL)

    print("KERNEL_OK")
</pallas_src>

<mosaic_0001>
module attributes {stable_mosaic.version = 11 : i64} {
  func.func @_mlp_kernel(%arg0: i32, %arg1: memref<8x128xbf16, #tpu.memory_space<vmem>>, %arg2: memref<128x128xbf16, #tpu.memory_space<vmem>>, %arg3: memref<1x128xf32, #tpu.memory_space<vmem>>, %arg4: memref<128x128xbf16, #tpu.memory_space<vmem>>, %arg5: memref<1x128xf32, #tpu.memory_space<vmem>>, %arg6: memref<128x128xbf16, #tpu.memory_space<vmem>>, %arg7: memref<1x128xf32, #tpu.memory_space<vmem>>, %arg8: memref<8x128xf32, #tpu.memory_space<vmem>>) attributes {dimension_semantics = [#tpu.dimension_semantics<parallel>], iteration_bounds = array<i64: 1>, scalar_prefetch = 0 : i64, scratch_operands = 0 : i64, tpu.core_type = #tpu.core_type<tc>, window_params = [{transform_indices = @transform_0, window_bounds = array<i64: 8, 128>}, {pipeline_mode = #tpu.pipeline_mode<synchronous>, transform_indices = @transform_1, window_bounds = array<i64: 128, 128>}, {pipeline_mode = #tpu.pipeline_mode<synchronous>, transform_indices = @transform_2, window_bounds = array<i64: 1, 128>}, {pipeline_mode = #tpu.pipeline_mode<synchronous>, transform_indices = @transform_3, window_bounds = array<i64: 128, 128>}, {pipeline_mode = #tpu.pipeline_mode<synchronous>, transform_indices = @transform_4, window_bounds = array<i64: 1, 128>}, {pipeline_mode = #tpu.pipeline_mode<synchronous>, transform_indices = @transform_5, window_bounds = array<i64: 128, 128>}, {pipeline_mode = #tpu.pipeline_mode<synchronous>, transform_indices = @transform_6, window_bounds = array<i64: 1, 128>}, {transform_indices = @transform_7, window_bounds = array<i64: 8, 128>}]} {
    %c0 = arith.constant 0 : index
    %c0_0 = arith.constant 0 : index
    %0 = vector.load %arg1[%c0, %c0_0] : memref<8x128xbf16, #tpu.memory_space<vmem>>, vector<8x128xbf16>
    %c0_1 = arith.constant 0 : index
    %c0_2 = arith.constant 0 : index
    %1 = vector.load %arg2[%c0_1, %c0_2] : memref<128x128xbf16, #tpu.memory_space<vmem>>, vector<128x128xbf16>
    %cst = arith.constant dense<0.000000e+00> : vector<8x128xf32>
    %2 = tpu.matmul %0, %1, %cst {dimension_numbers = #tpu.dot_dimension_numbers<[1], [0], [0], [1], [0, 0, 1, 1], [], []>} : vector<8x128xbf16>, vector<128x128xbf16>, vector<8x128xf32> -> vector<8x128xf32>
    %c0_3 = arith.constant 0 : index
    %c0_4 = arith.constant 0 : index
    %3 = vector.load %arg3[%c0_3, %c0_4] : memref<1x128xf32, #tpu.memory_space<vmem>>, vector<1x128xf32>
    %4 = vector.broadcast %3 : vector<1x128xf32> to vector<8x128xf32>
    %5 = arith.addf %2, %4 : vector<8x128xf32>
    %6 = math.tanh %5 : vector<8x128xf32>
    %7 = arith.truncf %6 : vector<8x128xf32> to vector<8x128xbf16>
    %c0_5 = arith.constant 0 : index
    %c0_6 = arith.constant 0 : index
    %8 = vector.load %arg4[%c0_5, %c0_6] : memref<128x128xbf16, #tpu.memory_space<vmem>>, vector<128x128xbf16>
    %cst_7 = arith.constant dense<0.000000e+00> : vector<8x128xf32>
    %9 = tpu.matmul %7, %8, %cst_7 {dimension_numbers = #tpu.dot_dimension_numbers<[1], [0], [0], [1], [0, 0, 1, 1], [], []>} : vector<8x128xbf16>, vector<128x128xbf16>, vector<8x128xf32> -> vector<8x128xf32>
    %c0_8 = arith.constant 0 : index
    %c0_9 = arith.constant 0 : index
    %10 = vector.load %arg5[%c0_8, %c0_9] : memref<1x128xf32, #tpu.memory_space<vmem>>, vector<1x128xf32>
    %11 = vector.broadcast %10 : vector<1x128xf32> to vector<8x128xf32>
    %12 = arith.addf %9, %11 : vector<8x128xf32>
    %13 = math.tanh %12 : vector<8x128xf32>
    %14 = arith.truncf %13 : vector<8x128xf32> to vector<8x128xbf16>
    %c0_10 = arith.constant 0 : index
    %c0_11 = arith.constant 0 : index
    %15 = vector.load %arg6[%c0_10, %c0_11] : memref<128x128xbf16, #tpu.memory_space<vmem>>, vector<128x128xbf16>
    %cst_12 = arith.constant dense<0.000000e+00> : vector<8x128xf32>
    %16 = tpu.matmul %14, %15, %cst_12 {dimension_numbers = #tpu.dot_dimension_numbers<[1], [0], [0], [1], [0, 0, 1, 1], [], []>} : vector<8x128xbf16>, vector<128x128xbf16>, vector<8x128xf32> -> vector<8x128xf32>
    %c0_13 = arith.constant 0 : index
    %c0_14 = arith.constant 0 : index
    %17 = vector.load %arg7[%c0_13, %c0_14] : memref<1x128xf32, #tpu.memory_space<vmem>>, vector<1x128xf32>
    %18 = vector.broadcast %17 : vector<1x128xf32> to vector<8x128xf32>
    %19 = arith.addf %16, %18 : vector<8x128xf32>
    %c0_15 = arith.constant 0 : index
    %c0_16 = arith.constant 0 : index
    %20 = vector.load %arg8[%c0_15, %c0_16] : memref<8x128xf32, #tpu.memory_space<vmem>>, vector<8x128xf32>
    tpu.vector_store %arg8[%c0_15, %c0_16], %19 {strides = array<i32>} : memref<8x128xf32, #tpu.memory_space<vmem>>, vector<8x128xf32>,
    return
  }
  func.func @transform_0(%arg0: i32) -> (i32, i32) {
    %c0_i32 = arith.constant 0 : i32
    %c0_i32_0 = arith.constant 0 : i32
    return %arg0, %c0_i32 : i32, i32
  }
  func.func @transform_1(%arg0: i32) -> (i32, i32) {
    %c0_i32 = arith.constant 0 : i32
    %c0_i32_0 = arith.constant 0 : i32
    %c0_i32_1 = arith.constant 0 : i32
    return %c0_i32, %c0_i32_0 : i32, i32
  }
  func.func @transform_2(%arg0: i32) -> (i32, i32) {
    %c0_i32 = arith.constant 0 : i32
    %c0_i32_0 = arith.constant 0 : i32
    %c0_i32_1 = arith.constant 0 : i32
    return %c0_i32, %c0_i32_0 : i32, i32
  }
  func.func @transform_3(%arg0: i32) -> (i32, i32) {
    %c0_i32 = arith.constant 0 : i32
    %c0_i32_0 = arith.constant 0 : i32
    %c0_i32_1 = arith.constant 0 : i32
    return %c0_i32, %c0_i32_0 : i32, i32
  }
  func.func @transform_4(%arg0: i32) -> (i32, i32) {
    %c0_i32 = arith.constant 0 : i32
    %c0_i32_0 = arith.constant 0 : i32
    %c0_i32_1 = arith.constant 0 : i32
    return %c0_i32, %c0_i32_0 : i32, i32
  }
  func.func @transform_5(%arg0: i32) -> (i32, i32) {
    %c0_i32 = arith.constant 0 : i32
    %c0_i32_0 = arith.constant 0 : i32
    %c0_i32_1 = arith.constant 0 : i32
    return %c0_i32, %c0_i32_0 : i32, i32
  }
  func.func @transform_6(%arg0: i32) -> (i32, i32) {
    %c0_i32 = arith.constant 0 : i32
    %c0_i32_0 = arith.constant 0 : i32
    %c0_i32_1 = arith.constant 0 : i32
    return %c0_i32, %c0_i32_0 : i32, i32
  }
  func.func @transform_7(%arg0: i32) -> (i32, i32) {
    %c0_i32 = arith.constant 0 : i32
    %c0_i32_0 = arith.constant 0 : i32
    return %arg0, %c0_i32 : i32, i32
  }
}

</mosaic_0001>

<bundles_post_ra>
// kernel: forward.1
= control target key start
LH: loop header
LB: loop body
LE: loop exit
PB: predicated region body
PF: predicated region fallthrough
CT: control target
= control target key end

     0   :  { %12 = vsyncpa [#allocation3], 0  ;;  %s605_s0 = inlined_call_operand.vmem [shape: bf16[8,128], index: 0, kind: input, shape index: {}]   ;;  %s606_s1 = inlined_call_operand.hbm [shape: bf16[128,128], index: 1, kind: input, shape index: {}]   ;;  %s607_s2 = inlined_call_operand.vmem [shape: f32[1,128], index: 2, kind: input, shape index: {}]   ;;  %s608_s3 = inlined_call_operand.hbm [shape: bf16[128,128], index: 3, kind: input, shape index: {}]   ;;  %s609_s4 = inlined_call_operand.vmem [shape: f32[1,128], index: 4, kind: input, shape index: {}]   ;;  %s610_s5 = inlined_call_operand.hbm [shape: bf16[128,128], index: 5, kind: input, shape index: {}]   ;;  %s611_s6 = inlined_call_operand.vmem [shape: f32[1,128], index: 6, kind: input, shape index: {}]   ;;  %s612_s7 = inlined_call_operand.vmem [shape: f32[8,128], index: 7, kind: output, shape index: {}]  }
   0x1   :  { %13 = vsyncpa [#allocation5], 0  ;;  %s35_s26 = sshll.u32 %s608_s3, 4  ;;  %s536_s27 = smov [#allocation4]   ;;  %s36_s26 = int_to_ptr.hbm [resolvable:$true] %s35_s26 }
   0x2   :  { %s37_s28 = sshll.u32 %s536_s27, 4  ;;  %s20_s8 = sshll.u32 %s606_s1, 4  ;;  %s38_s28 = int_to_ptr.vmem [resolvable:$true] %s37_s28  ;;  %s21_s8 = int_to_ptr.hbm [resolvable:$true] %s20_s8 }
   0x3   :  { %s537_s9 = smov 64   ;;  %s538_s10 = smov 4  }
   0x4   :  { %43 = dma.hbm_to_vmem [thread:$0]  %s36_s26, 1024, %s38_s28, [#allocation5], %s537_s9, %s537_s9, %s538_s10  }
   0x5   :  { %s539_s11 = smov [#allocation2]   ;;  %s50_s15 = sshll.u32 %s610_s5, 4  ;;  %s51_s15 = int_to_ptr.hbm [resolvable:$true] %s50_s15 }
   0x6   :  { %s22_s12 = sshll.u32 %s539_s11, 4  ;;  %s540_s3 = smov [#allocation6]   ;;  %s23_s12 = int_to_ptr.vmem [resolvable:$true] %s22_s12 }
   0x7   :  { %28 = dma.hbm_to_vmem [thread:$0]  %s21_s8, 1024, %s23_s12, [#allocation3], %s537_s9, %s537_s9, %s538_s10  }
   0x8   :  { %s52_s16 = sshll.u32 %s540_s3, 4  ;;  %s53_s16 = int_to_ptr.vmem [resolvable:$true] %s52_s16 }
   0x9   :  { %58 = dma.hbm_to_vmem [thread:$0]  %s51_s15, 1024, %s53_s16, [#allocation5], %s537_s9, %s537_s9, %s538_s10  }
   0xa   :  { %532 = dma.done.wait [#allocation3], 1024  }
   0xb   :  { %533 = vsyncadd [#allocation3], 4294966272 }
   0xc   :  { %534 = dma.done.wait [#allocation5], 2048  }
   0xd   :  { %535 = vsyncadd [#allocation5], 4294965248  ;;  %v431_v0 = vld [vmem:[#allocation2 + $0x38] sm:$0xff]  ;;  %v430_v1 = vld [vmem:[#allocation2 + $0x30] sm:$0xff] }
   0xe   :  { %142 = vmatpush.bf16.msra.mxu0 %v431_v0  ;;  %v439_v2 = vld [vmem:[#allocation4 + $0x38] sm:$0xff]  ;;  %v438_v3 = vld [vmem:[#allocation4 + $0x30] sm:$0xff]  ;;  %v429_v4 = vld [vmem:[#allocation2 + $0x28] sm:$0xff] }
   0xf   :  { %225 = vmatpush.bf16.msra.mxu1 %v439_v2  ;;  %v437_v5 = vld [vmem:[#allocation4 + $0x28] sm:$0xff]  ;;  %v428_v6 = vld [vmem:[#allocation2 + $0x20] sm:$0xff]  ;;  %v427_v8 = vld [vmem:[#allocation2 + $0x18] sm:$0xff] }
  0x10   :  { %v436_v7 = vld [vmem:[#allocation4 + $0x20] sm:$0xff]  ;;  %v435_v9 = vld [vmem:[#allocation4 + $0x18] sm:$0xff]  ;;  %v426_v10 = vld [vmem:[#allocation2 + $0x10] sm:$0xff] }
  0x11   :  { %v425_v11 = vld [vmem:[#allocation2 + $0x8] sm:$0xff]  ;;  %v424_v12 = vld [vmem:[#allocation2] sm:$0xff]  ;;  %v434_v14 = vld [vmem:[#allocation4 + $0x10] sm:$0xff] }
  0x12   :  { %143 = vmatpush.bf16.msra.mxu0 %v430_v1  ;;  %v73_v13 = vld [vmem:[%s605_s0] sm:$0xf]  ;;  %v433_v15 = vld [vmem:[#allocation4 + $0x8] sm:$0xff]  ;;  %v447_v17 = vld [vmem:[#allocation6 + $0x38] sm:$0xff] }
  0x13   :  { %226 = vmatpush.bf16.msra.mxu1 %v438_v3  ;;  %v432_v16 = vld [vmem:[#allocation4] sm:$0xff]  ;;  %308 = vmatpush.bf16.msra.mxu2 %v447_v17  ;;  %v446_v18 = vld [vmem:[#allocation6 + $0x30] sm:$0xff]  ;;  %v445_v19 = vld [vmem:[#allocation6 + $0x28] sm:$0xff] }
  0x14   :  { %v444_v20 = vld [vmem:[#allocation6 + $0x20] sm:$0xff]  ;;  %v443_v21 = vld [vmem:[#allocation6 + $0x18] sm:$0xff]  ;;  %v442_v28 = vld [vmem:[#allocation6 + $0x10] sm:$0xff] }
  0x15   :  { %v453_v22 = vld [vmem:[%s607_s2] ss:$0 sm:$0xff]  ;;  %v441_v29 = vld [vmem:[#allocation6 + $0x8] sm:$0xff] }
  0x16   :  { %144 = vmatpush.bf16.msra.mxu0 %v429_v4  ;;  %v440_v30 = vld [vmem:[#allocation6] sm:$0xff] }
  0x17   :  { %227 = vmatpush.bf16.msra.mxu1 %v437_v5  ;;  %309 = vmatpush.bf16.msra.mxu2 %v446_v18  ;;  %v454_v31 = vld [vmem:[%s609_s4] ss:$0 sm:$0xff] }
  0x18   :  { %v455_v37 = vld [vmem:[%s611_s6] ss:$0 sm:$0xff] }
  0x1a   :  { %145 = vmatpush.bf16.msra.mxu0 %v428_v6 }
  0x1b   :  { %228 = vmatpush.bf16.msra.mxu1 %v436_v7  ;;  %310 = vmatpush.bf16.msra.mxu2 %v445_v19 }
  0x1e   :  { %146 = vmatpush.bf16.msra.mxu0 %v427_v8 }
  0x1f   :  { %229 = vmatpush.bf16.msra.mxu1 %v435_v9  ;;  %311 = vmatpush.bf16.msra.mxu2 %v444_v20 }
  0x22   :  { %147 = vmatpush.bf16.msra.mxu0 %v426_v10 }
  0x23   :  { %230 = vmatpush.bf16.msra.mxu1 %v434_v14  ;;  %312 = vmatpush.bf16.msra.mxu2 %v443_v21 }
  0x26   :  { %148 = vmatpush.bf16.msra.mxu0 %v425_v11 }
  0x27   :  { %231 = vmatpush.bf16.msra.mxu1 %v433_v15  ;;  %313 = vmatpush.bf16.msra.mxu2 %v442_v28 }
  0x2a   :  { %149 = vmatpush.bf16.msra.mxu0 %v424_v12 }
  0x2b   :  { %232 = vmatpush.bf16.msra.mxu1 %v432_v16  ;;  %314 = vmatpush.bf16.msra.mxu2 %v441_v29 }
  0x2d   :  { %150 = vmatmul.bf16.vlgmr.msra.gmra.mxu0 %v73_v13 }
  0x2f   :  { %315 = vmatpush.bf16.msra.mxu2 %v440_v30 }
  0xaa   :  { %v151_v23 = vpop.f32.mrf.mxu0 }
  0xab   :  { %v152_v24 = vadd.f32 %v453_v22, %v151_v23 }
  0xad   :  { %456 = vtanh.f32 %v152_v24 }
  0xb2   :  { %v153_v25 = vpop.f32.mrf.mxu0 }
  0xb3   :  { %v457_v26 = vpop.eup %456 }
  0xb4   :  { %v156_v27 = vpack.c.bf16 %v457_v26, %v457_v26 }
  0xb6   :  { %233 = vmatmul.bf16.vlgmr.msra.gmra.mxu1 %v156_v27 }
 0x133   :  { %v234_v32 = vpop.f32.mrf.mxu1 }
 0x134   :  { %v235_v33 = vadd.f32 %v454_v31, %v234_v32 }
 0x136   :  { %458 = vtanh.f32 %v235_v33 }
 0x13b   :  { %v236_v34 = vpop.f32.mrf.mxu1 }
 0x13c   :  { %v459_v35 = vpop.eup %458 }
 0x13d   :  { %v239_v36 = vpack.c.bf16 %v459_v35, %v459_v35 }
 0x13f   :  { %316 = vmatmul.bf16.vlgmr.msra.gmra.mxu2 %v239_v36 }
 0x1c2   :  { %v317_v38 = vpop.f32.mrf.mxu2 }
 0x1c3   :  { %v318_v39 = vadd.f32 %v455_v37, %v317_v38 }
 0x1c5   :  { %321 = vst [vmem:[%s612_s7] sm:$0xff] %v318_v39 }
 0x1ca   :  { %v319_v40 = vpop.f32.mrf.mxu2 }
 0x1cb   :  { %326 = vsyncpa [#allocation3], 1 }
 0x1cc   :  { %327 = vsyncpa [#allocation5], 1 }

</bundles_post_ra>
